<compile_context>
chip_gen: v7x
topology: tpu7x:2x2x1
jax: 0.10.0
libtpu: 0.0.40
codegen_flags: <defaults>
</compile_context>

<pallas_src>
import functools

import jax
import jax.numpy as jnp
from jax.experimental import pallas as pl
from jax.experimental.pallas import tpu as pltpu


def _shift_lanes(x, off):
    """result[:, l] = x[:, (l + off) % n].  Wrapped lanes are zeroed by the caller's mask."""
    if off == 0:
        return x
    n = x.shape[1]
    s = off % n  # Python modulo -> non-negative static shift
    return jnp.concatenate([x[:, s:], x[:, :s]], axis=1)


def _encoder_conv_kernel(x_ref, mask_ref, w_ref, pgb_ref, o_ref, *,
                         num_batch, hw, width, num_groups, group_size,
                         k_pad, inv_count, eps):
    # x_ref:    (Cin, N*HW)   f32 input, channels on sublanes, batch+spatial on lanes
    # mask_ref: (9, N*HW)     f32 0/1 validity masks for the 9 conv taps (zero padding)
    # w_ref:    (Cout, Kp)    bf16 conv weights in (ky, kx, cin) order, zero-padded to Kp
    # pgb_ref:  (Cout, 3)     f32 [conv bias | gn gamma | gn beta]
    # o_ref:    (N, Cout, HW) f32 output (lane-dense, already NCHW layout)
    x = x_ref[...]                                   # (Cin, N*HW) f32
    cin, nhw = x.shape

    # ---- fused im2col: 9 shifted + masked taps built in VMEM, no HBM expansion ----
    taps = []
    tap_idx = 0
    for dy in (-1, 0, 1):
        for dx in (-1, 0, 1):
            off = dy * width + dx
            if dy == 0 and dx == 0:
                taps.append(x)                       # center tap: mask is all ones
            else:
                shifted = _shift_lanes(x, off)
                taps.append(shifted * mask_ref[tap_idx:tap_idx + 1, :])
            tap_idx += 1
    pad_rows = k_pad - cin * 9
    if pad_rows > 0:
        taps.append(jnp.zeros((pad_rows, nhw), jnp.float32))
    patches = jnp.concatenate(taps, axis=0).astype(jnp.bfloat16)   # (Kp, N*HW)

    # ---- convolution: single bf16 MXU matmul, f32 accumulation ----
    y = jnp.dot(w_ref[...], patches, preferred_element_type=jnp.float32)   # (Cout, N*HW)
    y = y + pgb_ref[:, 0:1]                          # conv bias (broadcast over lanes)

    gamma = pgb_ref[:, 1:2]                          # (Cout, 1)
    beta = pgb_ref[:, 2:3]                           # (Cout, 1)

    # ---- GroupNorm (two-pass variance, per (batch, group)) + ReLU ----
    for n in range(num_batch):                       # static: N is small
        groups_out = []
        for g in range(num_groups):                  # static: G is small
            c0 = g * group_size
            seg = y[c0:c0 + group_size, n * hw:(n + 1) * hw]       # (Cg, HW)
            mean = jnp.sum(seg, keepdims=True) * inv_count          # (1, 1)
            d = seg - mean
            var = jnp.sum(d * d, keepdims=True) * inv_count         # two-pass variance
            inv = jax.lax.rsqrt(var + eps)
            groups_out.append(d * (inv * gamma[c0:c0 + group_size])
                              + beta[c0:c0 + group_size])
        out_n = jnp.concatenate(groups_out, axis=0)                 # (Cout, HW)
        o_ref[n] = jnp.maximum(out_n, 0.0)                          # ReLU, lane-dense store


def encoder_conv_forward(x_nchw, conv_w, conv_b, gn_gamma, gn_beta, *, num_groups, eps=1e-5):
    """x_nchw: (N, Cin, H, W); conv_w: (Cout, Cin, 3, 3); returns (N, Cout, H, W)."""
    N, Cin, H, W = x_nchw.shape
    Cout = conv_w.shape[0]
    G = num_groups
    assert Cout % G == 0, "GroupNorm requires out_ch divisible by num_groups"
    Cg = Cout // G
    HW = H * W
    NHW = N * HW
    K = 9 * Cin
    Kp = -(-K // 16) * 16        # pad contraction dim to a bf16-sublane multiple (36 -> 48)

    # Input as (Cin, N*HW): channels on sublanes, batch+spatial folded onto lanes.
    x2 = jnp.transpose(x_nchw, (1, 0, 2, 3)).reshape(Cin, NHW).astype(jnp.float32)

    # Validity masks for the 9 taps (implements the conv's zero padding), (9, N*HW) f32.
    idx = jnp.arange(NHW, dtype=jnp.int32)
    ww = idx % W
    hh = (idx // W) % H
    masks = []
    for dy in (-1, 0, 1):
        for dx in (-1, 0, 1):
            masks.append((hh + dy >= 0) & (hh + dy < H) & (ww + dx >= 0) & (ww + dx < W))
    mask9 = jnp.stack(masks, axis=0).astype(jnp.float32)            # (9, N*HW)

    # Conv weights flattened in (ky, kx, cin) order (matches the tap build), zero-padded, bf16.
    w2 = jnp.transpose(conv_w, (0, 2, 3, 1)).reshape(Cout, K)
    w2 = jnp.pad(w2, ((0, 0), (0, Kp - K))).astype(jnp.bfloat16)    # (Cout, Kp)

    # Conv bias / gn gamma / gn beta merged into one (Cout, 3) f32 input -> one DMA.
    pgb = jnp.stack([conv_b, gn_gamma, gn_beta], axis=1).astype(jnp.float32)

    kernel = functools.partial(
        _encoder_conv_kernel,
        num_batch=N, hw=HW, width=W, num_groups=G, group_size=Cg,
        k_pad=Kp, inv_count=1.0 / float(Cg * HW), eps=float(eps))

    out = pl.pallas_call(
        kernel,
        out_shape=jax.ShapeDtypeStruct((N, Cout, HW), jnp.float32),
        grid_spec=pltpu.PrefetchScalarGridSpec(
            num_scalar_prefetch=0,
            grid=(1,),                               # single step: N folded onto lanes
            in_specs=[
                pl.BlockSpec((Cin, NHW), lambda i: (0, 0)),     # input slab
                pl.BlockSpec((9, NHW), lambda i: (0, 0)),       # tap masks
                pl.BlockSpec((Cout, Kp), lambda i: (0, 0)),     # conv weights (bf16)
                pl.BlockSpec((Cout, 3), lambda i: (0, 0)),      # bias | gamma | beta
            ],
            out_specs=pl.BlockSpec((N, Cout, HW), lambda i: (0, 0, 0)),
        ),
        compiler_params=pltpu.CompilerParams(dimension_semantics=("arbitrary",)),
    )(x2, mask9, w2, pgb)

    # (N, Cout, HW) is already NCHW once the spatial axis is unflattened — no transpose.
    return out.reshape(N, Cout, H, W).astype(x_nchw.dtype)


def _reference_forward(x_nchw, conv_w, conv_b, gn_gamma, gn_beta, *, num_groups, eps=1e-5):
    """Pure-JAX reference mirroring the PyTorch module (exact f32 conv)."""
    y = jax.lax.conv_general_dilated(
        x_nchw, conv_w, window_strides=(1, 1), padding=((1, 1), (1, 1)),
        dimension_numbers=('NCHW', 'OIHW', 'NCHW'),
        precision=jax.lax.Precision.HIGHEST)
    y = y + conv_b[None, :, None, None]
    N, C, H, W = y.shape
    G = num_groups
    yg = y.reshape(N, G, C // G, H, W)
    mean = jnp.mean(yg, axis=(2, 3, 4), keepdims=True)
    var = jnp.var(yg, axis=(2, 3, 4), keepdims=True)
    yg = (yg - mean) / jnp.sqrt(var + eps)
    y = yg.reshape(N, C, H, W)
    y = y * gn_gamma[None, :, None, None] + gn_beta[None, :, None, None]
    return jnp.maximum(y, 0.0)


if __name__ == "__main__":
    # Small shapes consistent with EncoderConv(in_ch=4, out_ch=8).
    N, Cin, H, W = 2, 4, 16, 16
    Cout = 8
    num_groups = Cout // 4  # GroupNorm(out_ch // 4, out_ch)

    key = jax.random.PRNGKey(0)
    k_x, k_w, k_b, k_g, k_be = jax.random.split(key, 5)

    x = jax.random.normal(k_x, (N, Cin, H, W), dtype=jnp.float32)
    conv_w = jax.random.normal(k_w, (Cout, Cin, 3, 3), dtype=jnp.float32) * 0.1
    conv_b = jax.random.normal(k_b, (Cout,), dtype=jnp.float32) * 0.1
    gn_gamma = 1.0 + 0.1 * jax.random.normal(k_g, (Cout,), dtype=jnp.float32)
    gn_beta = 0.1 * jax.random.normal(k_be, (Cout,), dtype=jnp.float32)

    fwd = jax.jit(functools.partial(encoder_conv_forward, num_groups=num_groups))
    out = fwd(x, conv_w, conv_b, gn_gamma, gn_beta)
    out = jax.block_until_ready(out)

    ref = _reference_forward(x, conv_w, conv_b, gn_gamma, gn_beta, num_groups=num_groups)
    ref = jax.block_until_ready(ref)

    assert out.shape == (N, Cout, H, W)
    # Kernel uses the bf16 MXU path (per perf guidance) vs an exact-f32 reference, so the
    # tolerance is sized for bf16 operand truncation on roughly unit-scale outputs.
    assert jnp.allclose(out, ref, rtol=2e-2, atol=3e-2), "mismatch vs reference"

    print("KERNEL_OK")
</pallas_src>

<mosaic_0001>
module attributes {stable_mosaic.version = 11 : i64} {
  func.func @_encoder_conv_kernel(%arg0: i32, %arg1: memref<4x512xf32, #tpu.memory_space<vmem>>, %arg2: memref<9x512xf32, #tpu.memory_space<vmem>>, %arg3: memref<8x48xbf16, #tpu.memory_space<vmem>>, %arg4: memref<8x3xf32, #tpu.memory_space<vmem>>, %arg5: memref<2x8x256xf32, #tpu.memory_space<vmem>>) attributes {dimension_semantics = [#tpu.dimension_semantics<arbitrary>], iteration_bounds = array<i64: 1>, scalar_prefetch = 0 : i64, scratch_operands = 0 : i64, tpu.core_type = #tpu.core_type<tc>, window_params = [{pipeline_mode = #tpu.pipeline_mode<synchronous>, transform_indices = @transform_0, window_bounds = array<i64: 4, 512>}, {pipeline_mode = #tpu.pipeline_mode<synchronous>, transform_indices = @transform_1, window_bounds = array<i64: 9, 512>}, {pipeline_mode = #tpu.pipeline_mode<synchronous>, transform_indices = @transform_2, window_bounds = array<i64: 8, 48>}, {pipeline_mode = #tpu.pipeline_mode<synchronous>, transform_indices = @transform_3, window_bounds = array<i64: 8, 3>}, {pipeline_mode = #tpu.pipeline_mode<synchronous>, transform_indices = @transform_4, window_bounds = array<i64: 2, 8, 256>}]} {
    %c0 = arith.constant 0 : index
    %c0_0 = arith.constant 0 : index
    %0 = vector.load %arg1[%c0, %c0_0] : memref<4x512xf32, #tpu.memory_space<vmem>>, vector<4x512xf32>
    %1 = vector.extract_strided_slice %0 {offsets = [0, 495], sizes = [4, 17], strides = [1, 1]} : vector<4x512xf32> to vector<4x17xf32>
    %2 = vector.extract_strided_slice %0 {offsets = [0, 0], sizes = [4, 495], strides = [1, 1]} : vector<4x512xf32> to vector<4x495xf32>
    %3 = tpu.concatenate %1, %2 in 1 : vector<4x17xf32>, vector<4x495xf32> -> vector<4x512xf32>
    %c0_1 = arith.constant 0 : index
    %c0_2 = arith.constant 0 : index
    %4 = vector.load %arg2[%c0_1, %c0_2] : memref<9x512xf32, #tpu.memory_space<vmem>>, vector<1x512xf32>
    %5 = vector.broadcast %4 : vector<1x512xf32> to vector<4x512xf32>
    %6 = arith.mulf %3, %5 : vector<4x512xf32>
    %7 = vector.extract_strided_slice %0 {offsets = [0, 496], sizes = [4, 16], strides = [1, 1]} : vector<4x512xf32> to vector<4x16xf32>
    %8 = vector.extract_strided_slice %0 {offsets = [0, 0], sizes = [4, 496], strides = [1, 1]} : vector<4x512xf32> to vector<4x496xf32>
    %9 = tpu.concatenate %7, %8 in 1 : vector<4x16xf32>, vector<4x496xf32> -> vector<4x512xf32>
    %c1 = arith.constant 1 : index
    %c0_3 = arith.constant 0 : index
    %10 = vector.load %arg2[%c1, %c0_3] : memref<9x512xf32, #tpu.memory_space<vmem>>, vector<1x512xf32>
    %11 = vector.broadcast %10 : vector<1x512xf32> to vector<4x512xf32>
    %12 = arith.mulf %9, %11 : vector<4x512xf32>
    %13 = vector.extract_strided_slice %0 {offsets = [0, 497], sizes = [4, 15], strides = [1, 1]} : vector<4x512xf32> to vector<4x15xf32>
    %14 = vector.extract_strided_slice %0 {offsets = [0, 0], sizes = [4, 497], strides = [1, 1]} : vector<4x512xf32> to vector<4x497xf32>
    %15 = tpu.concatenate %13, %14 in 1 : vector<4x15xf32>, vector<4x497xf32> -> vector<4x512xf32>
    %c2 = arith.constant 2 : index
    %c0_4 = arith.constant 0 : index
    %16 = vector.load %arg2[%c2, %c0_4] : memref<9x512xf32, #tpu.memory_space<vmem>>, vector<1x512xf32>
    %17 = vector.broadcast %16 : vector<1x512xf32> to vector<4x512xf32>
    %18 = arith.mulf %15, %17 : vector<4x512xf32>
    %19 = vector.extract_strided_slice %0 {offsets = [0, 511], sizes = [4, 1], strides = [1, 1]} : vector<4x512xf32> to vector<4x1xf32>
    %20 = vector.extract_strided_slice %0 {offsets = [0, 0], sizes = [4, 511], strides = [1, 1]} : vector<4x512xf32> to vector<4x511xf32>
    %21 = tpu.concatenate %19, %20 in 1 : vector<4x1xf32>, vector<4x511xf32> -> vector<4x512xf32>
    %c3 = arith.constant 3 : index
    %c0_5 = arith.constant 0 : index
    %22 = vector.load %arg2[%c3, %c0_5] : memref<9x512xf32, #tpu.memory_space<vmem>>, vector<1x512xf32>
    %23 = vector.broadcast %22 : vector<1x512xf32> to vector<4x512xf32>
    %24 = arith.mulf %21, %23 : vector<4x512xf32>
    %25 = vector.extract_strided_slice %0 {offsets = [0, 1], sizes = [4, 511], strides = [1, 1]} : vector<4x512xf32> to vector<4x511xf32>
    %26 = vector.extract_strided_slice %0 {offsets = [0, 0], sizes = [4, 1], strides = [1, 1]} : vector<4x512xf32> to vector<4x1xf32>
    %27 = tpu.concatenate %25, %26 in 1 : vector<4x511xf32>, vector<4x1xf32> -> vector<4x512xf32>
    %c5 = arith.constant 5 : index
    %c0_6 = arith.constant 0 : index
    %28 = vector.load %arg2[%c5, %c0_6] : memref<9x512xf32, #tpu.memory_space<vmem>>, vector<1x512xf32>
    %29 = vector.broadcast %28 : vector<1x512xf32> to vector<4x512xf32>
    %30 = arith.mulf %27, %29 : vector<4x512xf32>
    %31 = vector.extract_strided_slice %0 {offsets = [0, 15], sizes = [4, 497], strides = [1, 1]} : vector<4x512xf32> to vector<4x497xf32>
    %32 = vector.extract_strided_slice %0 {offsets = [0, 0], sizes = [4, 15], strides = [1, 1]} : vector<4x512xf32> to vector<4x15xf32>
    %33 = tpu.concatenate %31, %32 in 1 : vector<4x497xf32>, vector<4x15xf32> -> vector<4x512xf32>
    %c6 = arith.constant 6 : index
    %c0_7 = arith.constant 0 : index
    %34 = vector.load %arg2[%c6, %c0_7] : memref<9x512xf32, #tpu.memory_space<vmem>>, vector<1x512xf32>
    %35 = vector.broadcast %34 : vector<1x512xf32> to vector<4x512xf32>
    %36 = arith.mulf %33, %35 : vector<4x512xf32>
    %37 = vector.extract_strided_slice %0 {offsets = [0, 16], sizes = [4, 496], strides = [1, 1]} : vector<4x512xf32> to vector<4x496xf32>
    %38 = vector.extract_strided_slice %0 {offsets = [0, 0], sizes = [4, 16], strides = [1, 1]} : vector<4x512xf32> to vector<4x16xf32>
    %39 = tpu.concatenate %37, %38 in 1 : vector<4x496xf32>, vector<4x16xf32> -> vector<4x512xf32>
    %c7 = arith.constant 7 : index
    %c0_8 = arith.constant 0 : index
    %40 = vector.load %arg2[%c7, %c0_8] : memref<9x512xf32, #tpu.memory_space<vmem>>, vector<1x512xf32>
    %41 = vector.broadcast %40 : vector<1x512xf32> to vector<4x512xf32>
    %42 = arith.mulf %39, %41 : vector<4x512xf32>
    %43 = vector.extract_strided_slice %0 {offsets = [0, 17], sizes = [4, 495], strides = [1, 1]} : vector<4x512xf32> to vector<4x495xf32>
    %44 = vector.extract_strided_slice %0 {offsets = [0, 0], sizes = [4, 17], strides = [1, 1]} : vector<4x512xf32> to vector<4x17xf32>
    %45 = tpu.concatenate %43, %44 in 1 : vector<4x495xf32>, vector<4x17xf32> -> vector<4x512xf32>
    %c8 = arith.constant 8 : index
    %c0_9 = arith.constant 0 : index
    %46 = vector.load %arg2[%c8, %c0_9] : memref<9x512xf32, #tpu.memory_space<vmem>>, vector<1x512xf32>
    %47 = vector.broadcast %46 : vector<1x512xf32> to vector<4x512xf32>
    %48 = arith.mulf %45, %47 : vector<4x512xf32>
    %cst = arith.constant 0.000000e+00 : f32
    %49 = vector.broadcast %cst : f32 to vector<12x512xf32>
    %50 = tpu.concatenate %6, %12, %18, %24, %0, %30, %36, %42, %48, %49 in 0 : vector<4x512xf32>, vector<4x512xf32>, vector<4x512xf32>, vector<4x512xf32>, vector<4x512xf32>, vector<4x512xf32>, vector<4x512xf32>, vector<4x512xf32>, vector<4x512xf32>, vector<12x512xf32> -> vector<48x512xf32>
    %51 = arith.truncf %50 : vector<48x512xf32> to vector<48x512xbf16>
    %c0_10 = arith.constant 0 : index
    %c0_11 = arith.constant 0 : index
    %52 = vector.load %arg3[%c0_10, %c0_11] : memref<8x48xbf16, #tpu.memory_space<vmem>>, vector<8x48xbf16>
    %cst_12 = arith.constant dense<0.000000e+00> : vector<8x512xf32>
    %53 = tpu.matmul %52, %51, %cst_12 {dimension_numbers = #tpu.dot_dimension_numbers<[1], [0], [0], [1], [0, 0, 1, 1], [], []>} : vector<8x48xbf16>, vector<48x512xbf16>, vector<8x512xf32> -> vector<8x512xf32>
    %c0_13 = arith.constant 0 : index
    %c0_14 = arith.constant 0 : index
    %54 = vector.load %arg4[%c0_13, %c0_14] : memref<8x3xf32, #tpu.memory_space<vmem>>, vector<8x1xf32>
    %55 = vector.broadcast %54 : vector<8x1xf32> to vector<8x512xf32>
    %56 = arith.addf %53, %55 : vector<8x512xf32>
    %c0_15 = arith.constant 0 : index
    %c1_16 = arith.constant 1 : index
    %57 = vector.load %arg4[%c0_15, %c1_16] : memref<8x3xf32, #tpu.memory_space<vmem>>, vector<8x1xf32>
    %c0_17 = arith.constant 0 : index
    %c2_18 = arith.constant 2 : index
    %58 = vector.load %arg4[%c0_17, %c2_18] : memref<8x3xf32, #tpu.memory_space<vmem>>, vector<8x1xf32>
    %59 = vector.extract_strided_slice %56 {offsets = [0, 0], sizes = [4, 256], strides = [1, 1]} : vector<8x512xf32> to vector<4x256xf32>
    %60 = vector.shape_cast %59 : vector<4x256xf32> to vector<1x4x256xf32>
    %cst_19 = arith.constant dense<0.000000e+00> : vector<1xf32>
    %61 = vector.multi_reduction <add>, %60, %cst_19 [1, 2] : vector<1x4x256xf32> to vector<1xf32>
    %62 = vector.shape_cast %61 : vector<1xf32> to vector<1x1x1xf32>
    %63 = vector.extract %62[0, 0, 0] : f32 from vector<1x1x1xf32>
    %64 = vector.broadcast %63 : f32 to vector<1x1xf32>
    %cst_20 = arith.constant 9.765625E-4 : f32
    %65 = vector.broadcast %cst_20 : f32 to vector<1x1xf32>
    %66 = arith.mulf %64, %65 : vector<1x1xf32>
    %67 = vector.broadcast %66 : vector<1x1xf32> to vector<4x256xf32>
    %68 = arith.subf %59, %67 : vector<4x256xf32>
    %69 = arith.mulf %68, %68 : vector<4x256xf32>
    %70 = vector.shape_cast %69 : vector<4x256xf32> to vector<1x4x256xf32>
    %cst_21 = arith.constant dense<0.000000e+00> : vector<1xf32>
    %71 = vector.multi_reduction <add>, %70, %cst_21 [1, 2] : vector<1x4x256xf32> to vector<1xf32>
    %72 = vector.shape_cast %71 : vector<1xf32> to vector<1x1x1xf32>
    %73 = vector.extract %72[0, 0, 0] : f32 from vector<1x1x1xf32>
    %74 = vector.broadcast %73 : f32 to vector<1x1xf32>
    %cst_22 = arith.constant 9.765625E-4 : f32
    %75 = vector.broadcast %cst_22 : f32 to vector<1x1xf32>
    %76 = arith.mulf %74, %75 : vector<1x1xf32>
    %cst_23 = arith.constant 9.99999974E-6 : f32
    %77 = vector.broadcast %cst_23 : f32 to vector<1x1xf32>
    %78 = arith.addf %76, %77 : vector<1x1xf32>
    %79 = math.rsqrt %78 : vector<1x1xf32>
    %80 = vector.extract_strided_slice %57 {offsets = [0, 0], sizes = [4, 1], strides = [1, 1]} : vector<8x1xf32> to vector<4x1xf32>
    %81 = vector.broadcast %79 : vector<1x1xf32> to vector<4x1xf32>
    %82 = arith.mulf %81, %80 : vector<4x1xf32>
    %83 = vector.broadcast %82 : vector<4x1xf32> to vector<4x256xf32>
    %84 = arith.mulf %68, %83 : vector<4x256xf32>
    %85 = vector.extract_strided_slice %58 {offsets = [0, 0], sizes = [4, 1], strides = [1, 1]} : vector<8x1xf32> to vector<4x1xf32>
    %86 = vector.broadcast %85 : vector<4x1xf32> to vector<4x256xf32>
    %87 = arith.addf %84, %86 : vector<4x256xf32>
    %88 = vector.extract_strided_slice %56 {offsets = [4, 0], sizes = [4, 256], strides = [1, 1]} : vector<8x512xf32> to vector<4x256xf32>
    %89 = vector.shape_cast %88 : vector<4x256xf32> to vector<1x4x256xf32>
    %cst_24 = arith.constant dense<0.000000e+00> : vector<1xf32>
    %90 = vector.multi_reduction <add>, %89, %cst_24 [1, 2] : vector<1x4x256xf32> to vector<1xf32>
    %91 = vector.shape_cast %90 : vector<1xf32> to vector<1x1x1xf32>
    %92 = vector.extract %91[0, 0, 0] : f32 from vector<1x1x1xf32>
    %93 = vector.broadcast %92 : f32 to vector<1x1xf32>
    %cst_25 = arith.constant 9.765625E-4 : f32
    %94 = vector.broadcast %cst_25 : f32 to vector<1x1xf32>
    %95 = arith.mulf %93, %94 : vector<1x1xf32>
    %96 = vector.broadcast %95 : vector<1x1xf32> to vector<4x256xf32>
    %97 = arith.subf %88, %96 : vector<4x256xf32>
    %98 = arith.mulf %97, %97 : vector<4x256xf32>
    %99 = vector.shape_cast %98 : vector<4x256xf32> to vector<1x4x256xf32>
    %cst_26 = arith.constant dense<0.000000e+00> : vector<1xf32>
    %100 = vector.multi_reduction <add>, %99, %cst_26 [1, 2] : vector<1x4x256xf32> to vector<1xf32>
    %101 = vector.shape_cast %100 : vector<1xf32> to vector<1x1x1xf32>
    %102 = vector.extract %101[0, 0, 0] : f32 from vector<1x1x1xf32>
    %103 = vector.broadcast %102 : f32 to vector<1x1xf32>
    %cst_27 = arith.constant 9.765625E-4 : f32
    %104 = vector.broadcast %cst_27 : f32 to vector<1x1xf32>
    %105 = arith.mulf %103, %104 : vector<1x1xf32>
    %cst_28 = arith.constant 9.99999974E-6 : f32
    %106 = vector.broadcast %cst_28 : f32 to vector<1x1xf32>
    %107 = arith.addf %105, %106 : vector<1x1xf32>
    %108 = math.rsqrt %107 : vector<1x1xf32>
    %109 = vector.extract_strided_slice %57 {offsets = [4, 0], sizes = [4, 1], strides = [1, 1]} : vector<8x1xf32> to vector<4x1xf32>
    %110 = vector.broadcast %108 : vector<1x1xf32> to vector<4x1xf32>
    %111 = arith.mulf %110, %109 : vector<4x1xf32>
    %112 = vector.broadcast %111 : vector<4x1xf32> to vector<4x256xf32>
    %113 = arith.mulf %97, %112 : vector<4x256xf32>
    %114 = vector.extract_strided_slice %58 {offsets = [4, 0], sizes = [4, 1], strides = [1, 1]} : vector<8x1xf32> to vector<4x1xf32>
    %115 = vector.broadcast %114 : vector<4x1xf32> to vector<4x256xf32>
    %116 = arith.addf %113, %115 : vector<4x256xf32>
    %117 = tpu.concatenate %87, %116 in 0 : vector<4x256xf32>, vector<4x256xf32> -> vector<8x256xf32>
    %cst_29 = arith.constant 0.000000e+00 : f32
    %118 = vector.broadcast %cst_29 : f32 to vector<8x256xf32>
    %119 = arith.maximumf %117, %118 : vector<8x256xf32>
    %c0_30 = arith.constant 0 : index
    %c0_31 = arith.constant 0 : index
    %c0_32 = arith.constant 0 : index
    %120 = vector.load %arg5[%c0_30, %c0_31, %c0_32] : memref<2x8x256xf32, #tpu.memory_space<vmem>>, vector<1x8x256xf32>
    %121 = vector.shape_cast %120 : vector<1x8x256xf32> to vector<8x256xf32>
    %122 = vector.shape_cast %119 : vector<8x256xf32> to vector<1x8x256xf32>
    tpu.vector_store %arg5[%c0_30, %c0_31, %c0_32], %122 {strides = array<i32>} : memref<2x8x256xf32, #tpu.memory_space<vmem>>, vector<1x8x256xf32>,
    %123 = vector.extract_strided_slice %56 {offsets = [0, 256], sizes = [4, 256], strides = [1, 1]} : vector<8x512xf32> to vector<4x256xf32>
    %124 = vector.shape_cast %123 : vector<4x256xf32> to vector<1x4x256xf32>
    %cst_33 = arith.constant dense<0.000000e+00> : vector<1xf32>
    %125 = vector.multi_reduction <add>, %124, %cst_33 [1, 2] : vector<1x4x256xf32> to vector<1xf32>
    %126 = vector.shape_cast %125 : vector<1xf32> to vector<1x1x1xf32>
    %127 = vector.extract %126[0, 0, 0] : f32 from vector<1x1x1xf32>
    %128 = vector.broadcast %127 : f32 to vector<1x1xf32>
    %cst_34 = arith.constant 9.765625E-4 : f32
    %129 = vector.broadcast %cst_34 : f32 to vector<1x1xf32>
    %130 = arith.mulf %128, %129 : vector<1x1xf32>
    %131 = vector.broadcast %130 : vector<1x1xf32> to vector<4x256xf32>
    %132 = arith.subf %123, %131 : vector<4x256xf32>
    %133 = arith.mulf %132, %132 : vector<4x256xf32>
    %134 = vector.shape_cast %133 : vector<4x256xf32> to vector<1x4x256xf32>
    %cst_35 = arith.constant dense<0.000000e+00> : vector<1xf32>
    %135 = vector.multi_reduction <add>, %134, %cst_35 [1, 2] : vector<1x4x256xf32> to vector<1xf32>
    %136 = vector.shape_cast %135 : vector<1xf32> to vector<1x1x1xf32>
    %137 = vector.extract %136[0, 0, 0] : f32 from vector<1x1x1xf32>
    %138 = vector.broadcast %137 : f32 to vector<1x1xf32>
    %cst_36 = arith.constant 9.765625E-4 : f32
    %139 = vector.broadcast %cst_36 : f32 to vector<1x1xf32>
    %140 = arith.mulf %138, %139 : vector<1x1xf32>
    %cst_37 = arith.constant 9.99999974E-6 : f32
    %141 = vector.broadcast %cst_37 : f32 to vector<1x1xf32>
    %142 = arith.addf %140, %141 : vector<1x1xf32>
    %143 = math.rsqrt %142 : vector<1x1xf32>
    %144 = vector.extract_strided_slice %57 {offsets = [0, 0], sizes = [4, 1], strides = [1, 1]} : vector<8x1xf32> to vector<4x1xf32>
    %145 = vector.broadcast %143 : vector<1x1xf32> to vector<4x1xf32>
    %146 = arith.mulf %145, %144 : vector<4x1xf32>
    %147 = vector.broadcast %146 : vector<4x1xf32> to vector<4x256xf32>
    %148 = arith.mulf %132, %147 : vector<4x256xf32>
    %149 = vector.extract_strided_slice %58 {offsets = [0, 0], sizes = [4, 1], strides = [1, 1]} : vector<8x1xf32> to vector<4x1xf32>
    %150 = vector.broadcast %149 : vector<4x1xf32> to vector<4x256xf32>
    %151 = arith.addf %148, %150 : vector<4x256xf32>
    %152 = vector.extract_strided_slice %56 {offsets = [4, 256], sizes = [4, 256], strides = [1, 1]} : vector<8x512xf32> to vector<4x256xf32>
    %153 = vector.shape_cast %152 : vector<4x256xf32> to vector<1x4x256xf32>
    %cst_38 = arith.constant dense<0.000000e+00> : vector<1xf32>
    %154 = vector.multi_reduction <add>, %153, %cst_38 [1, 2] : vector<1x4x256xf32> to vector<1xf32>
    %155 = vector.shape_cast %154 : vector<1xf32> to vector<1x1x1xf32>
    %156 = vector.extract %155[0, 0, 0] : f32 from vector<1x1x1xf32>
    %157 = vector.broadcast %156 : f32 to vector<1x1xf32>
    %cst_39 = arith.constant 9.765625E-4 : f32
    %158 = vector.broadcast %cst_39 : f32 to vector<1x1xf32>
    %159 = arith.mulf %157, %158 : vector<1x1xf32>
    %160 = vector.broadcast %159 : vector<1x1xf32> to vector<4x256xf32>
    %161 = arith.subf %152, %160 : vector<4x256xf32>
    %162 = arith.mulf %161, %161 : vector<4x256xf32>
    %163 = vector.shape_cast %162 : vector<4x256xf32> to vector<1x4x256xf32>
    %cst_40 = arith.constant dense<0.000000e+00> : vector<1xf32>
    %164 = vector.multi_reduction <add>, %163, %cst_40 [1, 2] : vector<1x4x256xf32> to vector<1xf32>
    %165 = vector.shape_cast %164 : vector<1xf32> to vector<1x1x1xf32>
    %166 = vector.extract %165[0, 0, 0] : f32 from vector<1x1x1xf32>
    %167 = vector.broadcast %166 : f32 to vector<1x1xf32>
    %cst_41 = arith.constant 9.765625E-4 : f32
    %168 = vector.broadcast %cst_41 : f32 to vector<1x1xf32>
    %169 = arith.mulf %167, %168 : vector<1x1xf32>
    %cst_42 = arith.constant 9.99999974E-6 : f32
    %170 = vector.broadcast %cst_42 : f32 to vector<1x1xf32>
    %171 = arith.addf %169, %170 : vector<1x1xf32>
    %172 = math.rsqrt %171 : vector<1x1xf32>
    %173 = vector.extract_strided_slice %57 {offsets = [4, 0], sizes = [4, 1], strides = [1, 1]} : vector<8x1xf32> to vector<4x1xf32>
    %174 = vector.broadcast %172 : vector<1x1xf32> to vector<4x1xf32>
    %175 = arith.mulf %174, %173 : vector<4x1xf32>
    %176 = vector.broadcast %175 : vector<4x1xf32> to vector<4x256xf32>
    %177 = arith.mulf %161, %176 : vector<4x256xf32>
    %178 = vector.extract_strided_slice %58 {offsets = [4, 0], sizes = [4, 1], strides = [1, 1]} : vector<8x1xf32> to vector<4x1xf32>
    %179 = vector.broadcast %178 : vector<4x1xf32> to vector<4x256xf32>
    %180 = arith.addf %177, %179 : vector<4x256xf32>
    %181 = tpu.concatenate %151, %180 in 0 : vector<4x256xf32>, vector<4x256xf32> -> vector<8x256xf32>
    %cst_43 = arith.constant 0.000000e+00 : f32
    %182 = vector.broadcast %cst_43 : f32 to vector<8x256xf32>
    %183 = arith.maximumf %181, %182 : vector<8x256xf32>
    %c1_44 = arith.constant 1 : index
    %c0_45 = arith.constant 0 : index
    %c0_46 = arith.constant 0 : index
    %184 = vector.load %arg5[%c1_44, %c0_45, %c0_46] : memref<2x8x256xf32, #tpu.memory_space<vmem>>, vector<1x8x256xf32>
    %185 = vector.shape_cast %184 : vector<1x8x256xf32> to vector<8x256xf32>
    %186 = vector.shape_cast %183 : vector<8x256xf32> to vector<1x8x256xf32>
    tpu.vector_store %arg5[%c1_44, %c0_45, %c0_46], %186 {strides = array<i32>} : memref<2x8x256xf32, #tpu.memory_space<vmem>>, vector<1x8x256xf32>,
    return
  }
  func.func @transform_0(%arg0: i32) -> (i32, i32) {
    %c0_i32 = arith.constant 0 : i32
    %c0_i32_0 = arith.constant 0 : i32
    %c0_i32_1 = arith.constant 0 : i32
    return %c0_i32, %c0_i32_0 : i32, i32
  }
  func.func @transform_1(%arg0: i32) -> (i32, i32) {
    %c0_i32 = arith.constant 0 : i32
    %c0_i32_0 = arith.constant 0 : i32
    %c0_i32_1 = arith.constant 0 : i32
    return %c0_i32, %c0_i32_0 : i32, i32
  }
  func.func @transform_2(%arg0: i32) -> (i32, i32) {
    %c0_i32 = arith.constant 0 : i32
    %c0_i32_0 = arith.constant 0 : i32
    %c0_i32_1 = arith.constant 0 : i32
    return %c0_i32, %c0_i32_0 : i32, i32
  }
  func.func @transform_3(%arg0: i32) -> (i32, i32) {
    %c0_i32 = arith.constant 0 : i32
    %c0_i32_0 = arith.constant 0 : i32
    %c0_i32_1 = arith.constant 0 : i32
    return %c0_i32, %c0_i32_0 : i32, i32
  }
  func.func @transform_4(%arg0: i32) -> (i32, i32, i32) {
    %c0_i32 = arith.constant 0 : i32
    %c0_i32_0 = arith.constant 0 : i32
    %c0_i32_1 = arith.constant 0 : i32
    %c0_i32_2 = arith.constant 0 : i32
    return %c0_i32, %c0_i32_0, %c0_i32_1 : i32, i32, i32
  }
}

</mosaic_0001>

<bundles_post_ra>
// kernel: encoder_conv_forward.1
= control target key start
LH: loop header
LB: loop body
LE: loop exit
PB: predicated region body
PF: predicated region fallthrough
CT: control target
= control target key end

     0   :  { %v846_v1 = vmov 0   ;;  %s847_s17 = smov 1   ;;  %s848_s18 = smov 16   ;;  %v44_v6 = vlaneseq  ;;  %vm167_vm0 = vcmask 7168   ;;  %vm77_vm1 = vcmask 130048   ;;  %s1307_s0 = inlined_call_operand.vmem [shape: f32[4,512], index: 0, kind: input, shape index: {}]   ;;  %s1308_s3 = inlined_call_operand.vmem [shape: f32[8,3], index: 3, kind: input, shape index: {}]   ;;  %s1309_s1 = inlined_call_operand.vmem [shape: f32[9,512], index: 1, kind: input, shape index: {}]   ;;  %s1310_s2 = inlined_call_operand.vmem [shape: bf16[8,48], index: 2, kind: input, shape index: {}]   ;;  %s1311_s4 = inlined_call_operand.vmem [shape: f32[2,8,256], index: 4, kind: output, shape index: {}]  }
   0x1   :  { %v887_v0 = vld [vmem:[%s1307_s0] sm:$0xff]  ;;  %832 = vset.pattern.permute.xlu0 %v846_v1  ;;  %509 = vmatprep.mubr.bf16.mxu0 %v846_v1  ;;  %v900_v3 = vld [vmem:[%s1307_s0 + $0x8] sm:$0xff]  ;;  %s849_s21 = smov 17   ;;  %s850_s0 = smov 15   ;;  %vm33_vm2 = vcmask 138240   ;;  %vm122_vm3 = vcmask 121856  }
   0x2   :  { %161 = vrot.lane.b32.xlu1 %v887_v0, %s847_s17  ;;  %71 = vrot.lane.b32.xlu0 %v887_v0, %s848_s18  ;;  %v895_v2 = vcombine.high %v887_v0, %v887_v0  ;;  %v908_v4 = vcombine.high %v900_v3, %v900_v3  ;;  %s851_s22 = smov 127   ;;  %s852_s23 = smov 112   ;;  %v935_v5 = vld [vmem:[%s1308_s3] sm:$0xff]  ;;  %v948_v9 = vshrl.u32 %v44_v6, 7  ;;  %vm433_vm4 = vcmask 1043456  }
   0x3   :  { %550 = vmatprep.mubr.bf16.mxu1 %v846_v1  ;;  %s853_s24 = smov 113   ;;  %s854_s25 = smov 111   ;;  %v960_v13 = vld [vmem:[%s1309_s1 + $0x3] ss:$8 sm:$0xf]  ;;  %vm211_vm5 = vcmask 1039360  }
   0x4   :  { %v955_v12 = vsub.s32 1, %v948_v9  ;;  %v965_v14 = vld [vmem:[%s1309_s1 + $0x1] ss:$8 sm:$0xf]  ;;  %v983_v21 = vsub.s32 0, %v948_v9  ;;  %vm301_vm6 = vcmask 916480  }
   0x5   :  { %v976_v18 = vld [vmem:[%s1309_s1] ss:$8 sm:$0xf]  ;;  %v990_v23 = vld [vmem:[%s1309_s1 + $0x2] ss:$8 sm:$0xf] }
   0x6   :  { %163 = vrot.lane.b32.xlu1 %v895_v2, %s847_s17  ;;  %73 = vrot.lane.b32.xlu0 %v895_v2, %s848_s18  ;;  %v186_v17 = vrot.slane %v960_v13, %v955_v12  ;;  %v96_v20 = vrot.slane %v965_v14, %v955_v12  ;;  %v51_v25 = vrot.slane %v976_v18, %v955_v12  ;;  %v1033_v61 = vld [vmem:[%s1309_s1 + $0x5] ss:$8 sm:$0xf]  ;;  %v1038_v63 = vld [vmem:[%s1309_s1 + $0x7] ss:$8 sm:$0xf] }
   0x7   :  { %v182_v30 = vrot.slane %v960_v13, %v983_v21  ;;  %v92_v31 = vrot.slane %v965_v14, %v983_v21  ;;  %v141_v32 = vrot.slane %v990_v23, %v955_v12  ;;  %v137_v40 = vrot.slane %v990_v23, %v983_v21 }
   0x8   :  { %v47_v41 = vrot.slane %v976_v18, %v983_v21  ;;  %v231_v1 = vrot.slane %v1033_v61, %v955_v12  ;;  %vm256_vm7 = vcmask 924672   ;;  %vm346_vm8 = vcmask 908288  }
   0x9   :  { %vm855_vm9 = vmmov 1   ;;  %vm473_vm11 = vcmask 392192  }
   0xa   :  { %158 = vrot.lane.b32.xlu1 %v908_v4, %s847_s17  ;;  %68 = vrot.lane.b32.xlu0 %v908_v4, %s848_s18  ;;  %vm1103_vm10 = vmpackc.low %vm855_vm9, %vm433_vm4 }
   0xe   :  { %29 = vrot.lane.b32.xlu1 %v895_v2, %s849_s21  ;;  %27 = vrot.lane.b32.xlu0 %v887_v0, %s849_s21 }
  0x12   :  { %118 = vrot.lane.b32.xlu1 %v895_v2, %s850_s0  ;;  %116 = vrot.lane.b32.xlu0 %v887_v0, %s850_s0 }
  0x16   :  { %113 = vrot.lane.b32.xlu1 %v908_v4, %s850_s0  ;;  %22 = vrot.lane.b32.xlu0 %v908_v4, %s849_s21 }
  0x1a   :  { %207 = vrot.lane.b32.xlu1 %v900_v3, %s851_s22  ;;  %205 = vrot.lane.b32.xlu0 %v895_v2, %s851_s22 }
  0x1e   :  { %297 = vrot.lane.b32.xlu1 %v900_v3, %s852_s23  ;;  %295 = vrot.lane.b32.xlu0 %v895_v2, %s852_s23 }
  0x22   :  { %293 = vrot.lane.b32.xlu1 %v887_v0, %s852_s23  ;;  %203 = vrot.lane.b32.xlu0 %v887_v0, %s851_s22 }
  0x26   :  { %252 = vrot.lane.b32.xlu1 %v900_v3, %s853_s24  ;;  %250 = vrot.lane.b32.xlu0 %v895_v2, %s853_s24 }
  0x2a   :  { %340 = vrot.lane.b32.xlu1 %v895_v2, %s854_s25  ;;  %248 = vrot.lane.b32.xlu0 %v887_v0, %s853_s24 }
  0x2e   :  { %338 = vrot.lane.b32.xlu1 %v887_v0, %s854_s25  ;;  %342 = vrot.lane.b32.xlu0 %v900_v3, %s854_s25 }
  0x32   :  { %75 = vrot.lane.b32.xlu1 %v900_v3, %s848_s18  ;;  %470 = vperm.xlu0 %832, %v935_v5  }
  0x36   :  { %165 = vrot.lane.b32.xlu1 %v900_v3, %s847_s17  ;;  %31 = vrot.lane.b32.xlu0 %v900_v3, %s849_s21 }
  0x3a   :  { %120 = vrot.lane.b32.xlu1 %v900_v3, %s850_s0  ;;  %209 = vrot.lane.b32.xlu0 %v908_v4, %s851_s22 }
  0x3e   :  { %299 = vrot.lane.b32.xlu1 %v908_v4, %s852_s23  ;;  %254 = vrot.lane.b32.xlu0 %v908_v4, %s853_s24 }
  0x42   :  { %344 = vrot.lane.b32.xlu0 %v908_v4, %s854_s25 }
  0x74   :  { %v162_v7 = vpop.permute.xlu1 %161  ;;  %v72_v8 = vpop.permute.xlu0 %71 }
  0x78   :  { %v950_v10 = vpop.permute.xlu1 %163  ;;  %v952_v11 = vpop.permute.xlu0 %73 }
  0x79   :  { %v168_v19 = vsel %vm167_vm0, %v162_v7, %v950_v10  ;;  %v78_v22 = vsel %vm77_vm1, %v72_v8, %v952_v11 }
  0x7a   :  { %v200_v27 = vmul.f32 %v186_v17, %v168_v19  ;;  %v110_v29 = vmul.f32 %v96_v20, %v78_v22  ;;  %v321_v17 = vrot.slane %v1038_v63, %v955_v12  ;;  %v1053_v20 = vld [vmem:[%s1309_s1 + $0x6] ss:$8 sm:$0xf] }
  0x7c   :  { %v967_v15 = vpop.permute.xlu1 %158  ;;  %v969_v16 = vpop.permute.xlu0 %68  ;;  %v400_v38 = vrot.slane %v200_v27, 4  ;;  %v388_v42 = vrot.slane %v110_v29, 4 }
  0x7d   :  { %v175_v33 = vsel %vm167_vm0, %v967_v15, %v162_v7  ;;  %v85_v34 = vsel %vm77_vm1, %v969_v16, %v72_v8 }
  0x7e   :  { %v199_v43 = vmul.f32 %v182_v30, %v175_v33  ;;  %v109_v44 = vmul.f32 %v92_v31, %v85_v34  ;;  %v317_v30 = vrot.slane %v1038_v63, %v983_v21  ;;  %v276_v31 = vrot.slane %v1053_v20, %v955_v12 }
  0x80   :  { %v992_v24 = vpop.permute.xlu1 %29  ;;  %v28_v26 = vpop.permute.xlu0 %27  ;;  %v399_v53 = vrot.slane %v199_v43, 4  ;;  %v387_v54 = vrot.slane %v109_v44, 4  ;;  %v1078_v43 = vld [vmem:[%s1309_s1 + $0x20] ss:$8 sm:$0xf] }
  0x81   :  { %v34_v28 = vsel %vm33_vm2, %v28_v26, %v992_v24 }
  0x82   :  { %v65_v35 = vmul.f32 %v51_v25, %v34_v28 }
  0x84   :  { %v1008_v36 = vpop.permute.xlu1 %118  ;;  %v117_v37 = vpop.permute.xlu0 %116  ;;  %v435_v48 = vsel %vm433_vm4, %v65_v35, %v388_v42  ;;  %v272_v42 = vrot.slane %v1053_v20, %v983_v21 }
  0x85   :  { %v123_v39 = vsel %vm122_vm3, %v117_v37, %v1008_v36 }
  0x86   :  { %v155_v45 = vmul.f32 %v141_v32, %v123_v39 }
  0x88   :  { %v1016_v46 = vpop.permute.xlu1 %113  ;;  %v1018_v47 = vpop.permute.xlu0 %22  ;;  %v439_v49 = vsel %vm433_vm4, %v155_v45, %v400_v38 }
  0x89   :  { %v130_v50 = vsel %vm122_vm3, %v1016_v46, %v117_v37  ;;  %v41_v51 = vsel %vm33_vm2, %v1018_v47, %v28_v26  ;;  %v455_v52 = vpack.c.bf16 %v439_v49, %v435_v48  ;;  %v227_v26 = vrot.slane %v1033_v61, %v983_v21 }
  0x8a   :  { %v154_v55 = vmul.f32 %v137_v40, %v130_v50  ;;  %v64_v56 = vmul.f32 %v47_v41, %v41_v51 }
  0x8b   :  { %477 = vmatprep.subr.bf16.mxu0 %v455_v52 }
  0x8c   :  { %v1026_v57 = vpop.permute.xlu1 %207  ;;  %v206_v58 = vpop.permute.xlu0 %205  ;;  %v434_v59 = vsel %vm433_vm4, %v64_v56, %v387_v54  ;;  %v438_v60 = vsel %vm433_vm4, %v154_v55, %v399_v53  ;;  %v362_v55 = vrot.slane %v1078_v43, %v983_v21  ;;  %v366_v56 = vrot.slane %v1078_v43, %v955_v12 }
  0x8d   :  { %v454_v62 = vpack.c.bf16 %v438_v60, %v434_v59  ;;  %v213_v8 = vsel %vm211_vm5, %v206_v58, %v1026_v57 }
  0x8e   :  { %v245_v22 = vmul.f32 %v231_v1, %v213_v8 }
  0x8f   :  { %478 = vmatpush1.bf16.msra.mxu0 %v454_v62 }
  0x90   :  { %v1042_v6 = vpop.permute.xlu1 %297  ;;  %v296_v7 = vpop.permute.xlu0 %295  ;;  %v414_v33 = vrot.slane %v245_v22, 4 }
  0x91   :  { %v303_v19 = vsel %vm301_vm6, %v296_v7, %v1042_v6 }
  0x92   :  { %v335_v29 = vmul.f32 %v321_v17, %v303_v19  ;;  %v443_v49 = vsel %vm433_vm4, %v895_v2, %v414_v33  ;;  %v856_v17 = vmov 0.0  }
  0x94   :  { %v1055_v25 = vpop.permute.xlu1 %293  ;;  %v1059_v27 = vpop.permute.xlu0 %203  ;;  %v426_v39 = vrot.slane %v335_v29, 4  ;;  %v1119_v29 = vsub.s32 2, %v948_v9 }
  0x95   :  { %v212_v28 = vsel %vm211_vm5, %v1059_v27, %v206_v58  ;;  %v302_v32 = vsel %vm301_vm6, %v1055_v25, %v296_v7 }
  0x96   :  { %v244_v34 = vmul.f32 %v227_v26, %v212_v28  ;;  %v334_v40 = vmul.f32 %v317_v30, %v302_v32  ;;  %v1116_v26 = vld [vmem:[%s1310_s2] sm:$0xf]  ;;  %v1122_v30 = vsub.s32 3, %v948_v9 }
  0x98   :  { %v1069_v35 = vpop.permute.xlu1 %252  ;;  %v251_v37 = vpop.permute.xlu0 %250  ;;  %v413_v44 = vrot.slane %v244_v34, 4  ;;  %v425_v53 = vrot.slane %v334_v40, 4  ;;  %v104_v32 = vrot.slane %v965_v14, %v1122_v30  ;;  %v194_v9 = vrot.slane %v960_v13, %v1122_v30 }
  0x99   :  { %v258_v38 = vsel %vm256_vm7, %v251_v37, %v1069_v35 }
  0x9a   :  { %v290_v41 = vmul.f32 %v276_v31, %v258_v38  ;;  %v442_v2 = vsel %vm433_vm4, %v887_v0, %v413_v44  ;;  %v100_v31 = vrot.slane %v965_v14, %v1119_v29  ;;  %v145_v14 = vrot.slane %v990_v23, %v1119_v29 }
  0x9c   :  { %v341_v45 = vpop.permute.xlu1 %340  ;;  %v1080_v48 = vpop.permute.xlu0 %248  ;;  %v447_v50 = vsel %vm433_vm4, %v290_v41, %v426_v39 }
  0x9d   :  { %v257_v51 = vsel %vm256_vm7, %v1080_v48, %v251_v37  ;;  %v459_v52 = vpack.c.bf16 %v447_v50, %v443_v49  ;;  %v190_v37 = vrot.slane %v960_v13, %v1119_v29  ;;  %v59_v49 = vrot.slane %v976_v18, %v1122_v30 }
  0x9e   :  { %v289_v54 = vmul.f32 %v272_v42, %v257_v51  ;;  %v329_v50 = vrot.slane %v1038_v63, %v1122_v30 }
  0x9f   :  { %479 = vmatprep.subr.bf16.mxu0 %v459_v52 }
  0xa0   :  { %v1091_v58 = vpop.permute.xlu1 %338  ;;  %v1093_v59 = vpop.permute.xlu0 %342  ;;  %v446_v60 = vsel %vm433_vm4, %v289_v54, %v425_v53  ;;  %v239_v54 = vrot.slane %v1033_v61, %v1122_v30 }
  0xa1   :  { %v347_v62 = vsel %vm346_vm8, %v1091_v58, %v341_v45  ;;  %v348_v1 = vsel %vm346_vm8, %v341_v45, %v1093_v59  ;;  %v458_v21 = vpack.c.bf16 %v446_v60, %v442_v2 }
  0xa2   :  { %v379_v7 = vmul.f32 %v362_v55, %v347_v62  ;;  %v380_v8 = vmul.f32 %v366_v56, %v348_v1 }
  0xa3   :  { %480 = vmatpush1.bf16.msra.mxu0 %v458_v21 }
  0xa4   :  { %v791_v0 = vpack.c.bf16 %v856_v17, %v379_v7  ;;  %v788_v19 = vpack.c.bf16 %v856_v17, %v380_v8  ;;  %v76_v22 = vpop.permute.xlu1 %75  ;;  %v284_v8 = vrot.slane %v1053_v20, %v1122_v30 }
  0xa5   :  { %v79_v33 = vsel %vm77_vm1, %v952_v11, %v76_v22  ;;  %v80_v34 = vsel %vm77_vm1, %v76_v22, %v969_v16  ;;  %v149_v11 = vrot.slane %v990_v23, %v1122_v30  ;;  %v325_v23 = vrot.slane %v1038_v63, %v1119_v29 }
  0xa6   :  { %789 = vmatprep.subr.msk.bf16.mxu0 %vm1103_vm10, %v788_v19  ;;  %v111_v41 = vmul.f32 %v100_v31, %v79_v33  ;;  %v112_v42 = vmul.f32 %v104_v32, %v80_v34 }
  0xa7   :  { %792 = vmatpush1.bf16.msk.msra.mxu0 %vm1103_vm10, %v791_v0 }
  0xa8   :  { %v166_v28 = vpop.permute.xlu1 %165  ;;  %v389_v55 = vrot.slane %v111_v41, 4  ;;  %v390_v56 = vrot.slane %v112_v42, 4 }
  0xa9   :  { %v169_v39 = vsel %vm167_vm0, %v950_v10, %v166_v28  ;;  %v170_v40 = vsel %vm167_vm0, %v166_v28, %v967_v15  ;;  %v55_v15 = vrot.slane %v976_v18, %v1119_v29 }
  0xaa   :  { %793 = vmatmul.mubr.msk.bf16.vlgmr.msra.gmra.mrb[0].mxu0 %vm473_vm11, %v1116_v26  ;;  %v201_v10 = vmul.f32 %v190_v37, %v169_v39  ;;  %v202_v45 = vmul.f32 %v194_v9, %v170_v40  ;;  %v374_v40 = vrot.slane %v1078_v43, %v1122_v30 }
  0xac   :  { %v121_v38 = vpop.permute.xlu1 %120  ;;  %v401_v60 = vrot.slane %v201_v10, 4  ;;  %v402_v63 = vrot.slane %v202_v45, 4 }
  0xad   :  { %v124_v13 = vsel %vm122_vm3, %v1008_v36, %v121_v38  ;;  %v125_v44 = vsel %vm122_vm3, %v121_v38, %v1016_v46  ;;  %v235_v46 = vrot.slane %v1033_v61, %v1119_v29  ;;  %v280_v61 = vrot.slane %v1053_v20, %v1119_v29 }
  0xae   :  { %v156_v51 = vmul.f32 %v145_v14, %v124_v13  ;;  %v157_v52 = vmul.f32 %v149_v11, %v125_v44 }
  0xb0   :  { %v300_v36 = vpop.permute.xlu1 %299  ;;  %v440_v22 = vsel %vm433_vm4, %v156_v51, %v401_v60 }
  0xb1   :  { %v1146_v16 = vpop.permute.xlu0 %470  ;;  %v304_v21 = vsel %vm301_vm6, %v1042_v6, %v300_v36  ;;  %v310_v7 = vsel %vm301_vm6, %v300_v36, %v1055_v25 }
  0xb2   :  { %v336_v32 = vmul.f32 %v325_v23, %v304_v21  ;;  %v337_v33 = vmul.f32 %v329_v50, %v310_v7 }
  0xb4   :  { %v427_v14 = vrot.slane %v336_v32, 4  ;;  %v428_v11 = vrot.slane %v337_v33, 4 }
  0xb5   :  { %v32_v53 = vpop.permute.xlu0 %31 }
  0xb6   :  { %v35_v18 = vsel %vm33_vm2, %v992_v24, %v32_v53  ;;  %v36_v2 = vsel %vm33_vm2, %v32_v53, %v1018_v47  ;;  %v441_v47 = vsel %vm433_vm4, %v157_v52, %v402_v63 }
  0xb7   :  { %v66_v62 = vmul.f32 %v55_v15, %v35_v18  ;;  %v67_v1 = vmul.f32 %v59_v49, %v36_v2 }
  0xb9   :  { %v210_v24 = vpop.permute.xlu0 %209  ;;  %v437_v0 = vsel %vm433_vm4, %v67_v1, %v390_v56  ;;  %v436_v19 = vsel %vm433_vm4, %v66_v62, %v389_v55 }
  0xba   :  { %v214_v6 = vsel %vm211_vm5, %v1026_v57, %v210_v24  ;;  %v220_v25 = vsel %vm211_vm5, %v210_v24, %v1059_v27  ;;  %v457_v28 = vpack.c.bf16 %v441_v47, %v437_v0  ;;  %v456_v31 = vpack.c.bf16 %v440_v22, %v436_v19 }
  0xbb   :  { %v246_v20 = vmul.f32 %v235_v46, %v214_v6  ;;  %v247_v34 = vmul.f32 %v239_v54, %v220_v25  ;;  %v370_v27 = vrot.slane %v1078_v43, %v1119_v29 }
  0xbc   :  { %518 = vmatprep.subr.bf16.mxu1 %v457_v28 }
  0xbd   :  { %v415_v37 = vrot.slane %v246_v20, 4  ;;  %v416_v9 = vrot.slane %v247_v34, 4  ;;  %519 = vmatpush1.bf16.msra.mxu1 %v456_v31  ;;  %v255_v38 = vpop.permute.xlu0 %254 }
  0xbe   :  { %v259_v39 = vsel %vm256_vm7, %v1069_v35, %v255_v38  ;;  %v265_v57 = vsel %vm256_vm7, %v255_v38, %v1080_v48 }
  0xbf   :  { %v291_v41 = vmul.f32 %v280_v61, %v259_v39  ;;  %v292_v42 = vmul.f32 %v284_v8, %v265_v57  ;;  %v445_v44 = vsel %vm433_vm4, %v908_v4, %v416_v9  ;;  %v444_v35 = vsel %vm433_vm4, %v900_v3, %v415_v37 }
  0xc1   :  { %v345_v13 = vpop.permute.xlu0 %344  ;;  %v449_v10 = vsel %vm433_vm4, %v292_v42, %v428_v11  ;;  %v448_v48 = vsel %vm433_vm4, %v291_v41, %v427_v14 }
  0xc2   :  { %v349_v29 = vsel %vm346_vm8, %v1093_v59, %v345_v13  ;;  %v355_v43 = vsel %vm346_vm8, %v345_v13, %v1091_v58  ;;  %v461_v30 = vpack.c.bf16 %v449_v10, %v445_v44  ;;  %v460_v45 = vpack.c.bf16 %v448_v48, %v444_v35 }
  0xc3   :  { %v381_v15 = vmul.f32 %v370_v27, %v349_v29  ;;  %v382_v49 = vmul.f32 %v374_v40, %v355_v43  ;;  %v857_v27 = vmov 1  }
  0xc4   :  { %520 = vmatprep.subr.bf16.mxu1 %v461_v30  ;;  %833 = vset.pattern.permute.xlu1 %v857_v27 }
  0xc5   :  { %v795_v4 = vpack.c.bf16 %v856_v17, %v382_v49  ;;  %521 = vmatpush1.bf16.msra.mxu1 %v460_v45  ;;  %v798_v23 = vpack.c.bf16 %v856_v17, %v381_v15 }
  0xc7   :  { %796 = vmatprep.subr.msk.bf16.mxu1 %vm1103_vm10, %v795_v4 }
  0xc9   :  { %799 = vmatpush1.bf16.msk.msra.mxu1 %vm1103_vm10, %v798_v23 }
  0xcc   :  { %800 = vmatmul.mubr.msk.bf16.vlgmr.msra.gmra.mrb[0].mxu1 %vm473_vm11, %v1116_v26 }
 0x17d   :  { %v511_v3 = vpop.f32.mrb[0].mxu0 }
 0x17e   :  { %v1211_v58 = vadd.f32 %v511_v3, %v1146_v16  ;;  %v513_v59 = vpop.f32.mrb[1].mxu0 }
 0x17f   :  { %v1214_v50 = vadd.f32 %v513_v59, %v1146_v16  ;;  %v515_v51 = vpop.f32.mrb[2].mxu0 }
 0x180   :  { %v516_v52 = vpop.f32.mrb[3].mxu0  ;;  %v559_v17 = vsel %vm433_vm4, %v1211_v58, 0.0  ;;  %v609_v36 = vrot.slane %v1211_v58, 4 }
 0x181   :  { %v560_v12 = vsel %vm433_vm4, %v1214_v50, 0.0  ;;  %v610_v26 = vrot.slane %v1214_v50, 4 }
 0x182   :  { %v561_v53 = vadd.f32 %v560_v12, %v559_v17  ;;  %v613_v46 = vsel %vm433_vm4, %v609_v36, 0.0 }
 0x183   :  { %v614_v54 = vsel %vm433_vm4, %v610_v26, 0.0 }
 0x184   :  { %562 = vadd.xlane.f32.xlu1 %v561_v53  ;;  %v615_v55 = vadd.f32 %v614_v54, %v613_v46 }
 0x188   :  { %616 = vadd.xlane.f32.xlu1 %v615_v55 }
 0x19f   :  { %v552_v56 = vpop.f32.mrb[0].mxu1 }
 0x1a0   :  { %v1225_v18 = vadd.f32 %v552_v56, %v1146_v16  ;;  %v554_v2 = vpop.f32.mrb[1].mxu1 }
 0x1a1   :  { %v1228_v60 = vadd.f32 %v554_v2, %v1146_v16  ;;  %v556_v63 = vpop.f32.mrb[2].mxu1 }
 0x1a2   :  { %v669_v62 = vsel %vm433_vm4, %v1225_v18, 0.0  ;;  %v715_v1 = vrot.slane %v1225_v18, 4  ;;  %v557_v21 = vpop.f32.mrb[3].mxu1 }
 0x1a3   :  { %v670_v7 = vsel %vm433_vm4, %v1228_v60, 0.0  ;;  %v716_v61 = vrot.slane %v1228_v60, 4 }
 0x1a4   :  { %v671_v8 = vadd.f32 %v670_v7, %v669_v62  ;;  %v719_v24 = vsel %vm433_vm4, %v715_v1, 0.0 }
 0x1a5   :  { %v720_v0 = vsel %vm433_vm4, %v716_v61, 0.0 }
 0x1a6   :  { %672 = vadd.xlane.f32.xlu1 %v671_v8  ;;  %v721_v16 = vadd.f32 %v720_v0, %v719_v24 }
 0x1aa   :  { %722 = vadd.xlane.f32.xlu1 %v721_v16 }
 0x211   :  { %v563_v47 = vpop.xlane.xlu1 %562 }
 0x212   :  { %v564_v19 = vrot.slane %v563_v47, 4 }
 0x214   :  { %v565_v22 = vadd.f32 %v564_v19, %v563_v47 }
 0x215   :  { %v617_v40 = vpop.xlane.xlu1 %616 }
 0x216   :  { %v566_v6 = vrot.slane %v565_v22, 2  ;;  %v618_v14 = vrot.slane %v617_v40, 4 }
 0x218   :  { %v567_v25 = vadd.f32 %v566_v6, %v565_v22  ;;  %v619_v11 = vadd.f32 %v618_v14, %v617_v40  ;;  %v858_v40 = vmov 2  }
 0x219   :  { %834 = vset.pattern.permute.xlu0 %v858_v40 }
 0x21a   :  { %v568_v28 = vrot.slane %v567_v25, 1  ;;  %v620_v41 = vrot.slane %v619_v11, 2 }
 0x21c   :  { %v569_v31 = vadd.f32 %v568_v28, %v567_v25  ;;  %v621_v10 = vadd.f32 %v620_v41, %v619_v11 }
 0x21e   :  { %803 = vpush %v569_v31  ;;  %v622_v29 = vrot.slane %v621_v10, 1 }
 0x220   :  { %v623_v45 = vadd.f32 %v622_v29, %v621_v10 }
 0x24f   :  { %s804_s2 = spop %803 }
 0x250   :  { %v571_v32 = vstv %s804_s2 }
 0x251   :  { %v572_v33 = vmul.f32 0.0009765625, %v571_v32 }
 0x253   :  { %v1239_v20 = vsub.f32 %v1211_v58, %v572_v33  ;;  %v1242_v34 = vsub.f32 %v1214_v50, %v572_v33 }
 0x255   :  { %v575_v37 = vmul.f32 %v1239_v20, %v1239_v20  ;;  %v576_v9 = vmul.f32 %v1242_v34, %v1242_v34 }
 0x257   :  { %v577_v38 = vsel %vm433_vm4, %v575_v37, 0.0  ;;  %v578_v39 = vsel %vm433_vm4, %v576_v9, 0.0 }
 0x258   :  { %v579_v57 = vadd.f32 %v578_v39, %v577_v38 }
 0x25a   :  { %580 = vadd.xlane.f32.xlu0 %v579_v57 }
 0x2e7   :  { %v581_v42 = vpop.xlane.xlu0 %580 }
 0x2e8   :  { %v582_v13 = vrot.slane %v581_v42, 4 }
 0x2ea   :  { %v583_v44 = vadd.f32 %v582_v13, %v581_v42 }
 0x2ec   :  { %v584_v35 = vrot.slane %v583_v44, 2 }
 0x2ee   :  { %v585_v48 = vadd.f32 %v584_v35, %v583_v44 }
 0x2f0   :  { %v586_v43 = vrot.slane %v585_v48, 1 }
 0x2f2   :  { %v587_v30 = vadd.f32 %v586_v43, %v585_v48 }
 0x2f4   :  { %805 = vpush %v587_v30 }
 0x2f5   :  { %807 = vpush %v623_v45 }
 0x325   :  { %s806_s18 = spop %805 }
 0x326   :  { %v589_v15 = vstv %s806_s18  ;;  %s808_s19 = spop %807 }
 0x327   :  { %v590_v49 = vmul.f32 0.0009765625, %v589_v15  ;;  %v625_v4 = vstv %s808_s19 }
 0x328   :  { %v626_v23 = vmul.f32 0.0009765625, %v625_v4 }
 0x329   :  { %v591_v3 = vadd.f32 1e-05, %v590_v49 }
 0x32a   :  { %v1252_v59 = vsub.f32 %v1211_v58, %v626_v23  ;;  %v1255_v51 = vsub.f32 %v1214_v50, %v626_v23  ;;  %v673_v50 = vpop.xlane.xlu1 %672 }
 0x32b   :  { %838 = vrsqrt.f32 %v591_v3  ;;  %v674_v55 = vrot.slane %v673_v50, 4 }
 0x32c   :  { %v629_v52 = vmul.f32 %v1252_v59, %v1252_v59  ;;  %v630_v17 = vmul.f32 %v1255_v51, %v1255_v51 }
 0x32d   :  { %v675_v56 = vadd.f32 %v674_v55, %v673_v50 }
 0x32e   :  { %v633_v36 = vrot.slane %v629_v52, 4  ;;  %v634_v12 = vrot.slane %v630_v17, 4  ;;  %v723_v14 = vpop.xlane.xlu1 %722 }
 0x32f   :  { %v676_v2 = vrot.slane %v675_v56, 2  ;;  %v724_v11 = vrot.slane %v723_v14, 4 }
 0x330   :  { %v637_v26 = vsel %vm433_vm4, %v633_v36, 0.0  ;;  %v638_v53 = vsel %vm433_vm4, %v634_v12, 0.0 }
 0x331   :  { %v639_v46 = vadd.f32 %v638_v53, %v637_v26  ;;  %v677_v21 = vadd.f32 %v676_v2, %v675_v56  ;;  %v725_v41 = vadd.f32 %v724_v11, %v723_v14 }
 0x333   :  { %640 = vadd.xlane.f32.xlu0 %v639_v46  ;;  %v678_v8 = vrot.slane %v677_v21, 1  ;;  %v726_v42 = vrot.slane %v725_v41, 2 }
 0x335   :  { %v839_v58 = vpop.eup %838  ;;  %v679_v16 = vadd.f32 %v678_v8, %v677_v21  ;;  %v727_v35 = vadd.f32 %v726_v42, %v725_v41 }
 0x336   :  { %v593_v54 = vmul.f32 %v839_v58, %v935_v5 }
 0x337   :  { %v728_v43 = vrot.slane %v727_v35, 1 }
 0x338   :  { %596 = vperm.xlu1 %833, %v593_v54  }
 0x339   :  { %v729_v15 = vadd.f32 %v728_v43, %v727_v35 }
 0x3c0   :  { %v641_v63 = vpop.xlane.xlu0 %640 }
 0x3c1   :  { %v642_v62 = vrot.slane %v641_v63, 4 }
 0x3c3   :  { %v643_v1 = vadd.f32 %v642_v62, %v641_v63 }
 0x3c5   :  { %v644_v7 = vrot.slane %v643_v1, 2 }
 0x3c7   :  { %v645_v61 = vadd.f32 %v644_v7, %v643_v1 }
 0x3c9   :  { %v646_v24 = vrot.slane %v645_v61, 1 }
 0x3cb   :  { %v647_v0 = vadd.f32 %v646_v24, %v645_v61 }
 0x3cd   :  { %809 = vpush %v647_v0 }
 0x3ce   :  { %811 = vpush %v679_v16 }
 0x3fe   :  { %s810_s20 = spop %809 }
 0x3ff   :  { %v649_v47 = vstv %s810_s20  ;;  %s812_s21 = spop %811 }
 0x400   :  { %v650_v19 = vmul.f32 0.0009765625, %v649_v47  ;;  %v681_v22 = vstv %s812_s21 }
 0x401   :  { %v682_v6 = vmul.f32 0.0009765625, %v681_v22 }
 0x402   :  { %v651_v25 = vadd.f32 1e-05, %v650_v19 }
 0x403   :  { %v1265_v28 = vsub.f32 %v1225_v18, %v682_v6  ;;  %v1268_v31 = vsub.f32 %v1228_v60, %v682_v6 }
 0x404   :  { %840 = vrsqrt.f32 %v651_v25 }
 0x405   :  { %v685_v32 = vmul.f32 %v1265_v28, %v1265_v28  ;;  %v686_v33 = vmul.f32 %v1268_v31, %v1268_v31 }
 0x407   :  { %v687_v37 = vsel %vm433_vm4, %v685_v32, 0.0  ;;  %v688_v9 = vsel %vm433_vm4, %v686_v33, 0.0 }
 0x408   :  { %v689_v38 = vadd.f32 %v688_v9, %v687_v37 }
 0x40a   :  { %690 = vadd.xlane.f32.xlu0 %v689_v38 }
 0x40e   :  { %v841_v39 = vpop.eup %840 }
 0x40f   :  { %v653_v57 = vmul.f32 %v841_v39, %v935_v5 }
 0x411   :  { %656 = vperm.xlu1 %833, %v653_v57  }
 0x497   :  { %v691_v13 = vpop.xlane.xlu0 %690 }
 0x498   :  { %v692_v44 = vrot.slane %v691_v13, 4 }
 0x49a   :  { %v693_v10 = vadd.f32 %v692_v44, %v691_v13 }
 0x49c   :  { %v694_v48 = vrot.slane %v693_v10, 2 }
 0x49e   :  { %v695_v29 = vadd.f32 %v694_v48, %v693_v10 }
 0x4a0   :  { %v696_v30 = vrot.slane %v695_v29, 1 }
 0x4a2   :  { %v697_v45 = vadd.f32 %v696_v30, %v695_v29 }
 0x4a4   :  { %813 = vpush %v697_v45 }
 0x4a5   :  { %815 = vpush %v729_v15 }
 0x4d5   :  { %s814_s0 = spop %813 }
 0x4d6   :  { %v699_v49 = vstv %s814_s0  ;;  %s816_s22 = spop %815 }
 0x4d7   :  { %v700_v4 = vmul.f32 0.0009765625, %v699_v49  ;;  %v731_v23 = vstv %s816_s22 }
 0x4d8   :  { %v732_v3 = vmul.f32 0.0009765625, %v731_v23 }
 0x4d9   :  { %v701_v52 = vadd.f32 1e-05, %v700_v4 }
 0x4da   :  { %v733_v17 = vsub.f32 %v1225_v18, %v732_v3  ;;  %v734_v36 = vsub.f32 %v1228_v60, %v732_v3  ;;  %v597_v18 = vpop.permute.xlu1 %596 }
 0x4db   :  { %842 = vrsqrt.f32 %v701_v52  ;;  %v599_v21 = vmul.f32 %v597_v18, %v1239_v20  ;;  %v600_v7 = vmul.f32 %v597_v18, %v1242_v34 }
 0x4dc   :  { %v735_v12 = vmul.f32 %v733_v17, %v733_v17  ;;  %v736_v26 = vmul.f32 %v734_v36, %v734_v36 }
 0x4de   :  { %v739_v53 = vrot.slane %v735_v12, 4  ;;  %v740_v46 = vrot.slane %v736_v26, 4  ;;  %v657_v62 = vpop.permute.xlu1 %656 }
 0x4df   :  { %v659_v61 = vmul.f32 %v657_v62, %v1252_v59  ;;  %v660_v8 = vmul.f32 %v657_v62, %v1255_v51 }
 0x4e0   :  { %v743_v58 = vsel %vm433_vm4, %v739_v53, 0.0  ;;  %v744_v54 = vsel %vm433_vm4, %v740_v46, 0.0 }
 0x4e1   :  { %v745_v50 = vadd.f32 %v744_v54, %v743_v58 }
 0x4e3   :  { %746 = vadd.xlane.f32.xlu0 %v745_v50 }
 0x4e5   :  { %v843_v55 = vpop.eup %842 }
 0x4e6   :  { %v703_v56 = vmul.f32 %v843_v55, %v935_v5 }
 0x4e8   :  { %706 = vperm.xlu1 %833, %v703_v56  }
 0x4f9   :  { %602 = vperm.xlu0 %834, %v935_v5  }
 0x4fd   :  { %835 = vset.pattern.permute.xlu0 %v857_v27 }
 0x567   :  { %v707_v38 = vpop.permute.xlu1 %706 }
 0x568   :  { %v709_v57 = vmul.f32 %v707_v38, %v1265_v28  ;;  %v710_v40 = vmul.f32 %v707_v38, %v1268_v31 }
 0x570   :  { %v747_v60 = vpop.xlane.xlu0 %746 }
 0x571   :  { %v748_v2 = vrot.slane %v747_v60, 4 }
 0x573   :  { %v749_v63 = vadd.f32 %v748_v2, %v747_v60 }
 0x575   :  { %v750_v1 = vrot.slane %v749_v63, 2 }
 0x577   :  { %v751_v24 = vadd.f32 %v750_v1, %v749_v63 }
 0x578   :  { %v603_v0 = vpop.permute.xlu0 %602 }
 0x579   :  { %v605_v16 = vadd.f32 %v603_v0, %v599_v21  ;;  %v606_v47 = vadd.f32 %v603_v0, %v600_v7  ;;  %v661_v19 = vadd.f32 %v659_v61, %v603_v0  ;;  %v662_v27 = vadd.f32 %v660_v8, %v603_v0 }
 0x57a   :  { %v752_v22 = vrot.slane %v751_v24, 1  ;;  %v711_v41 = vadd.f32 %v709_v57, %v603_v0  ;;  %v712_v42 = vadd.f32 %v710_v40, %v603_v0 }
 0x57b   :  { %v663_v6 = vsel %vm433_vm4, %v605_v16, %v661_v19  ;;  %v664_v25 = vsel %vm433_vm4, %v606_v47, %v662_v27 }
 0x57c   :  { %v753_v32 = vadd.f32 %v752_v22, %v751_v24  ;;  %v665_v33 = vmax.f32 %v663_v6, 0.0  ;;  %v666_v20 = vmax.f32 %v664_v25, 0.0 }
 0x57e   :  { %817 = vpush %v753_v32  ;;  %667 = vst [vmem:[%s1311_s4] sm:$0xff] %v665_v33 }
 0x57f   :  { %668 = vst [vmem:[%s1311_s4 + $0x8] sm:$0xff] %v666_v20 }
 0x5af   :  { %s818_s27 = spop %817 }
 0x5b0   :  { %v755_v34 = vstv %s818_s27 }
 0x5b1   :  { %v756_v59 = vmul.f32 0.0009765625, %v755_v34 }
 0x5b3   :  { %v757_v51 = vadd.f32 1e-05, %v756_v59 }
 0x5b5   :  { %844 = vrsqrt.f32 %v757_v51 }
 0x5bf   :  { %v845_v37 = vpop.eup %844 }
 0x5c0   :  { %v759_v9 = vmul.f32 %v845_v37, %v935_v5 }
 0x5c2   :  { %762 = vperm.xlu1 %833, %v759_v9  }
 0x641   :  { %v763_v39 = vpop.permute.xlu1 %762 }
 0x642   :  { %v765_v14 = vmul.f32 %v763_v39, %v733_v17  ;;  %v766_v11 = vmul.f32 %v763_v39, %v734_v36 }
 0x644   :  { %v767_v13 = vadd.f32 %v765_v14, %v603_v0  ;;  %v768_v44 = vadd.f32 %v766_v11, %v603_v0 }
 0x646   :  { %v769_v10 = vsel %vm433_vm4, %v711_v41, %v767_v13  ;;  %v770_v35 = vsel %vm433_vm4, %v712_v42, %v768_v44 }
 0x647   :  { %v771_v48 = vmax.f32 %v769_v10, 0.0  ;;  %v772_v29 = vmax.f32 %v770_v35, 0.0 }
 0x649   :  { %801 = vst [vmem:[%s1311_s4 + $0x10] sm:$0xff] %v771_v48  ;;  %802 = vst [vmem:[%s1311_s4 + $0x18] sm:$0xff] %v772_v29 }

</bundles_post_ra>
